<compile_context>
chip_gen: v6e
topology: v6e:2x2x1
jax: 0.10.0
libtpu: 0.0.40
codegen_flags: <defaults>
</compile_context>

<pallas_src>
import functools

import jax
import jax.numpy as jnp
from jax.experimental import pallas as pl
from jax.experimental.pallas import tpu as pltpu


# ---------------------------------------------------------------------------
# One fused kernel for the whole forward pass:
#   act = ReLU(...ReLU(x @ Wh1 + bh1)...)          (computed once per M tile)
#   out[:, j] = act @ Wf[:, j] + bf[j]             (lane-dense N tiles)
# ---------------------------------------------------------------------------
def _fused_mlp_kernel(*refs, num_hidden):
    x_ref = refs[0]
    hidden = refs[1:1 + 2 * num_hidden]
    wf_ref, bf_ref, o_ref, act_ref = refs[1 + 2 * num_hidden:]

    j = pl.program_id(1)

    @pl.when(j == 0)
    def _():
        h = x_ref[...]                                      # bf16
        for li in range(num_hidden):
            w = hidden[2 * li][...]                         # bf16 (kin, dn)
            b = hidden[2 * li + 1][...]                     # f32  (1, dn)
            y = jnp.dot(h, w, preferred_element_type=jnp.float32) + b
            h = jnp.maximum(y, 0.0).astype(act_ref.dtype)   # back to bf16
        act_ref[...] = h

    y = jnp.dot(act_ref[...], wf_ref[...], preferred_element_type=jnp.float32)
    o_ref[...] = (y + bf_ref[...]).astype(o_ref.dtype)


def _choose_block(dim, max_block, quantum):
    """Return (block, padded_dim).  Full dim if it is small; otherwise the
    largest multiple of `quantum` <= max_block that divides dim; otherwise pad
    dim up to a block multiple (never fall back to the whole dimension, so a
    large ragged batch cannot blow VMEM)."""
    if dim <= max_block:
        return dim, dim
    blk = (max_block // quantum) * quantum
    b = blk
    while b >= quantum:
        if dim % b == 0:
            return b, dim
        b -= quantum
    padded = ((dim + blk - 1) // blk) * blk
    return blk, padded


@functools.partial(jax.jit, static_argnames=("bm_max", "bn_max"))
def fused_mlp_forward(x, hidden_params, w_f, b_f, *, bm_max=256, bn_max=2048):
    """out = ReLU-stack(x) @ w_f + b_f in one pallas_call.
    x: (M, K_in) f32 -> (M, N) f32.  Matmul inputs bf16, accumulation f32."""
    M, K_in = x.shape
    Kh, N = w_f.shape
    num_hidden = len(hidden_params)

    bm, m_pad = _choose_block(M, bm_max, 16)    # 16: bf16 sublane packing
    bn, n_pad = _choose_block(N, bn_max, 128)   # lane-dense output tiles

    x_c = x.astype(jnp.bfloat16)
    if m_pad != M:
        x_c = jnp.pad(x_c, ((0, m_pad - M), (0, 0)))
    w_f_c = w_f.astype(jnp.bfloat16)
    b_f_c = b_f.reshape(1, N).astype(jnp.float32)
    if n_pad != N:
        w_f_c = jnp.pad(w_f_c, ((0, 0), (0, n_pad - N)))
        b_f_c = jnp.pad(b_f_c, ((0, 0), (0, n_pad - N)))

    hidden_dim = hidden_params[-1][0].shape[1] if num_hidden else K_in

    in_specs = [pl.BlockSpec((bm, K_in), lambda i, j: (i, 0))]
    operands = [x_c]
    for (w, b) in hidden_params:
        # Tiny weights: single full-array VMEM block, fetched once (constant
        # block index -> no re-DMA across the grid).
        in_specs.append(pl.BlockSpec(w.shape, lambda i, j: (0, 0)))
        in_specs.append(pl.BlockSpec((1, b.shape[0]), lambda i, j: (0, 0)))
        operands.append(w.astype(jnp.bfloat16))
        operands.append(b.reshape(1, -1).astype(jnp.float32))
    in_specs.append(pl.BlockSpec((Kh, bn), lambda i, j: (0, j)))
    in_specs.append(pl.BlockSpec((1, bn), lambda i, j: (0, j)))
    operands.append(w_f_c)
    operands.append(b_f_c)

    grid = (m_pad // bm, n_pad // bn)
    kernel = functools.partial(_fused_mlp_kernel, num_hidden=num_hidden)

    out = pl.pallas_call(
        kernel,
        out_shape=jax.ShapeDtypeStruct((m_pad, n_pad), jnp.float32),
        grid_spec=pltpu.PrefetchScalarGridSpec(
            num_scalar_prefetch=0,
            grid=grid,
            in_specs=in_specs,
            out_specs=pl.BlockSpec((bm, bn), lambda i, j: (i, j)),
            scratch_shapes=[pltpu.VMEM((bm, hidden_dim), jnp.bfloat16)],
        ),
        compiler_params=pltpu.CompilerParams(
            # M tiles may split across v7x's two TensorCores; N stays
            # sequential because the hidden stack is evaluated at j == 0.
            dimension_semantics=("parallel", "arbitrary"),
        ),
    )(*operands)

    if m_pad != M or n_pad != N:
        out = out[:M, :N]
    return out


# ---------------------------------------------------------------------------
# Module
# ---------------------------------------------------------------------------
def _xavier_uniform(key, fan_in, fan_out, shape):
    limit = (6.0 / (fan_in + fan_out)) ** 0.5
    return jax.random.uniform(key, shape, jnp.float32, -limit, limit)


class ConvTransposeLayersPallas:
    """JAX/Pallas equivalent of ConvTransposeLayers with
    conv_transpose = ConvTranspose2d(channels, out_channels, k=2, stride=2)."""

    def __init__(self, key, input_size, in_dense_n, in_dense_depth,
                 height, width, channels, out_channels=8, kernel_size=2):
        self.H, self.W, self.C = height, width, channels
        self.Cout, self.kH, self.kW = out_channels, kernel_size, kernel_size

        keys = jax.random.split(key, in_dense_depth + 3)

        # LinearLayers hidden stack: Linear -> ReLU, xavier weights, zero bias.
        self.hidden = []
        in_dim = input_size
        for i in range(in_dense_depth):
            w = _xavier_uniform(keys[i], in_dim, in_dense_n, (in_dim, in_dense_n))
            b = jnp.zeros((in_dense_n,), jnp.float32)
            self.hidden.append((w, b))
            in_dim = in_dense_n

        # Final Linear -> H*W*C (deterministic init here).
        out_dim = height * width * channels
        self.w_out = _xavier_uniform(keys[-3], in_dim, out_dim, (in_dim, out_dim))
        self.b_out = jax.random.uniform(keys[-2], (out_dim,), jnp.float32,
                                        -0.05, 0.05)

        # ConvTranspose2d weights: PyTorch layout (Cin, Cout, kH, kW).
        fan_in = channels * kernel_size * kernel_size
        fan_out = out_channels * kernel_size * kernel_size
        self.w_ct = _xavier_uniform(
            keys[-1], fan_in, fan_out,
            (channels, out_channels, kernel_size, kernel_size))
        self.b_ct = jax.random.uniform(jax.random.fold_in(keys[-1], 7),
                                       (out_channels,), jnp.float32, -0.05, 0.05)

        # Fold the non-overlapping (k == stride) transposed conv INTO the final
        # dense layer: columns of the composed weight are ordered
        # (h, ky, w, kx, co), so the kernel output reshapes directly to NHWC.
        w_out_r = self.w_out.reshape(in_dim, channels, height, width)
        w_fused = jnp.einsum("jchw,cokl->jhkwlo", w_out_r, self.w_ct)
        self.w_fused = w_fused.reshape(
            in_dim, height * self.kH * width * self.kW * out_channels)
        b_fused = jnp.einsum("chw,cokl->hkwlo",
                             self.b_out.reshape(channels, height, width),
                             self.w_ct) + self.b_ct
        self.b_fused = b_fused.reshape(-1)

    def __call__(self, x):
        if x.ndim < 2:
            raise Exception(
                "The dimension of input should be greater than or equal to 2")
        batch = x.shape[:-1]
        h = x.reshape(-1, x.shape[-1]).astype(jnp.float32)

        # Entire forward (hidden ReLU stack + dense-plus-conv-transpose fold)
        # in one fused Pallas kernel.
        out = fused_mlp_forward(h, tuple(self.hidden), self.w_fused, self.b_fused)

        # Free reshape: columns are already in NHWC order.
        H2, W2 = self.H * self.kH, self.W * self.kW
        return out.reshape(*batch, H2, W2, self.Cout)


# ---------------------------------------------------------------------------
# Pure-JAX reference (exact semantics of the PyTorch forward, f32 throughout)
# ---------------------------------------------------------------------------
def reference_forward(m: ConvTransposeLayersPallas, x):
    batch = x.shape[:-1]
    h = x.reshape(-1, x.shape[-1]).astype(jnp.float32)
    for w, b in m.hidden:
        h = jnp.maximum(h @ w + b, 0.0)
    h = h @ m.w_out + m.b_out
    B = h.shape[0]
    xn = h.reshape(B, m.C, m.H, m.W)                       # NCHW
    # ConvTranspose2d, kernel=stride=2, padding=0:
    # out[n, o, 2h+k, 2w+l] = sum_c xn[n,c,h,w] * W[c,o,k,l] + b[o]
    t = jnp.einsum("nchw,cokl->nhwklo", xn, m.w_ct) + m.b_ct
    t = jnp.transpose(t, (0, 1, 3, 2, 4, 5))               # n,h,k,w,l,o
    vis_nhwc = t.reshape(B, m.H * m.kH, m.W * m.kW, m.Cout)
    return vis_nhwc.reshape(*batch, *vis_nhwc.shape[1:])


if __name__ == "__main__":
    key = jax.random.PRNGKey(0)

    batch, input_size = 2, 32
    in_dense_n, in_dense_depth = 64, 1
    height = width = 16
    channels, out_channels = 4, 8

    module = ConvTransposeLayersPallas(
        key, input_size, in_dense_n, in_dense_depth,
        height, width, channels, out_channels=out_channels, kernel_size=2)

    x = jax.random.normal(jax.random.fold_in(key, 123),
                          (batch, input_size), dtype=jnp.float32)
    y = jax.block_until_ready(module(x))
    ref = reference_forward(module, x)
    assert y.shape == (batch, 2 * height, 2 * width, out_channels)
    # bf16 matmul inputs (f32 accumulate) -> slightly looser tolerance vs f32 ref.
    assert jnp.allclose(y, ref, atol=1e-2, rtol=1e-2), \
        float(jnp.max(jnp.abs(y - ref)))

    # Multi-dim leading batch (exercises the batch flatten / restore path).
    x2 = jax.random.normal(jax.random.fold_in(key, 456),
                           (2, 3, input_size), dtype=jnp.float32)
    y2 = jax.block_until_ready(module(x2))
    ref2 = reference_forward(module, x2)
    assert y2.shape == (2, 3, 2 * height, 2 * width, out_channels)
    assert jnp.allclose(y2, ref2, atol=1e-2, rtol=1e-2), \
        float(jnp.max(jnp.abs(y2 - ref2)))

    print("KERNEL_OK")
</pallas_src>

<mosaic_0001>
module attributes {stable_mosaic.version = 11 : i64} {
  func.func @_fused_mlp_kernel(%arg0: i32, %arg1: i32, %arg2: memref<2x32xbf16, #tpu.memory_space<vmem>>, %arg3: memref<32x64xbf16, #tpu.memory_space<vmem>>, %arg4: memref<1x64xf32, #tpu.memory_space<vmem>>, %arg5: memref<64x2048xbf16, #tpu.memory_space<vmem>>, %arg6: memref<1x2048xf32, #tpu.memory_space<vmem>>, %arg7: memref<2x2048xf32, #tpu.memory_space<vmem>>, %arg8: memref<2x64xbf16, #tpu.memory_space<vmem>>) attributes {dimension_semantics = [#tpu.dimension_semantics<parallel>, #tpu.dimension_semantics<arbitrary>], iteration_bounds = array<i64: 1, 4>, scalar_prefetch = 0 : i64, scratch_operands = 1 : i64, tpu.core_type = #tpu.core_type<tc>, window_params = [{transform_indices = @transform_0, window_bounds = array<i64: 2, 32>}, {pipeline_mode = #tpu.pipeline_mode<synchronous>, transform_indices = @transform_1, window_bounds = array<i64: 32, 64>}, {pipeline_mode = #tpu.pipeline_mode<synchronous>, transform_indices = @transform_2, window_bounds = array<i64: 1, 64>}, {transform_indices = @transform_3, window_bounds = array<i64: 64, 2048>}, {transform_indices = @transform_4, window_bounds = array<i64: 1, 2048>}, {transform_indices = @transform_5, window_bounds = array<i64: 2, 2048>}]} {
    %c0_i32 = arith.constant 0 : i32
    %0 = arith.cmpi eq, %arg1, %c0_i32 : i32
    %1 = arith.extui %0 : i1 to i32
    %c0_i32_0 = arith.constant 0 : i32
    %2 = arith.cmpi ne, %1, %c0_i32_0 : i32
    scf.if %2 {
      %c0_8 = arith.constant 0 : index
      %c0_9 = arith.constant 0 : index
      %10 = vector.load %arg2[%c0_8, %c0_9] : memref<2x32xbf16, #tpu.memory_space<vmem>>, vector<2x32xbf16>
      %c0_10 = arith.constant 0 : index
      %c0_11 = arith.constant 0 : index
      %11 = vector.load %arg3[%c0_10, %c0_11] : memref<32x64xbf16, #tpu.memory_space<vmem>>, vector<32x64xbf16>
      %c0_12 = arith.constant 0 : index
      %c0_13 = arith.constant 0 : index
      %12 = vector.load %arg4[%c0_12, %c0_13] : memref<1x64xf32, #tpu.memory_space<vmem>>, vector<1x64xf32>
      %cst_14 = arith.constant dense<0.000000e+00> : vector<2x64xf32>
      %13 = tpu.matmul %10, %11, %cst_14 {dimension_numbers = #tpu.dot_dimension_numbers<[1], [0], [0], [1], [0, 0, 1, 1], [], []>} : vector<2x32xbf16>, vector<32x64xbf16>, vector<2x64xf32> -> vector<2x64xf32>
      %14 = vector.broadcast %12 : vector<1x64xf32> to vector<2x64xf32>
      %15 = arith.addf %13, %14 : vector<2x64xf32>
      %cst_15 = arith.constant 0.000000e+00 : f32
      %16 = vector.broadcast %cst_15 : f32 to vector<2x64xf32>
      %17 = arith.maximumf %15, %16 : vector<2x64xf32>
      %18 = arith.truncf %17 : vector<2x64xf32> to vector<2x64xbf16>
      %c0_16 = arith.constant 0 : index
      %c0_17 = arith.constant 0 : index
      %19 = vector.load %arg8[%c0_16, %c0_17] : memref<2x64xbf16, #tpu.memory_space<vmem>>, vector<2x64xbf16>
      tpu.vector_store %arg8[%c0_16, %c0_17], %18 {strides = array<i32>} : memref<2x64xbf16, #tpu.memory_space<vmem>>, vector<2x64xbf16>,
    } else {
    }
    %c0 = arith.constant 0 : index
    %c0_1 = arith.constant 0 : index
    %3 = vector.load %arg8[%c0, %c0_1] : memref<2x64xbf16, #tpu.memory_space<vmem>>, vector<2x64xbf16>
    %c0_2 = arith.constant 0 : index
    %c0_3 = arith.constant 0 : index
    %4 = vector.load %arg5[%c0_2, %c0_3] : memref<64x2048xbf16, #tpu.memory_space<vmem>>, vector<64x2048xbf16>
    %cst = arith.constant dense<0.000000e+00> : vector<2x2048xf32>
    %5 = tpu.matmul %3, %4, %cst {dimension_numbers = #tpu.dot_dimension_numbers<[1], [0], [0], [1], [0, 0, 1, 1], [], []>} : vector<2x64xbf16>, vector<64x2048xbf16>, vector<2x2048xf32> -> vector<2x2048xf32>
    %c0_4 = arith.constant 0 : index
    %c0_5 = arith.constant 0 : index
    %6 = vector.load %arg6[%c0_4, %c0_5] : memref<1x2048xf32, #tpu.memory_space<vmem>>, vector<1x2048xf32>
    %7 = vector.broadcast %6 : vector<1x2048xf32> to vector<2x2048xf32>
    %8 = arith.addf %5, %7 : vector<2x2048xf32>
    %c0_6 = arith.constant 0 : index
    %c0_7 = arith.constant 0 : index
    %9 = vector.load %arg7[%c0_6, %c0_7] : memref<2x2048xf32, #tpu.memory_space<vmem>>, vector<2x2048xf32>
    tpu.vector_store %arg7[%c0_6, %c0_7], %8 {strides = array<i32>} : memref<2x2048xf32, #tpu.memory_space<vmem>>, vector<2x2048xf32>,
    return
  }
  func.func @transform_0(%arg0: i32, %arg1: i32) -> (i32, i32) {
    %c0_i32 = arith.constant 0 : i32
    %c0_i32_0 = arith.constant 0 : i32
    return %arg0, %c0_i32 : i32, i32
  }
  func.func @transform_1(%arg0: i32, %arg1: i32) -> (i32, i32) {
    %c0_i32 = arith.constant 0 : i32
    %c0_i32_0 = arith.constant 0 : i32
    %c0_i32_1 = arith.constant 0 : i32
    return %c0_i32, %c0_i32_0 : i32, i32
  }
  func.func @transform_2(%arg0: i32, %arg1: i32) -> (i32, i32) {
    %c0_i32 = arith.constant 0 : i32
    %c0_i32_0 = arith.constant 0 : i32
    %c0_i32_1 = arith.constant 0 : i32
    return %c0_i32, %c0_i32_0 : i32, i32
  }
  func.func @transform_3(%arg0: i32, %arg1: i32) -> (i32, i32) {
    %c0_i32 = arith.constant 0 : i32
    %c0_i32_0 = arith.constant 0 : i32
    return %c0_i32, %arg1 : i32, i32
  }
  func.func @transform_4(%arg0: i32, %arg1: i32) -> (i32, i32) {
    %c0_i32 = arith.constant 0 : i32
    %c0_i32_0 = arith.constant 0 : i32
    return %c0_i32, %arg1 : i32, i32
  }
  func.func @transform_5(%arg0: i32, %arg1: i32) -> (i32, i32) {
    %c0_i32 = arith.constant 0 : i32
    return %arg0, %arg1 : i32, i32
  }
}

</mosaic_0001>

<bundles_post_ra>
// kernel: fused_mlp_forward.1
= control target key start
LH: loop header
LB: loop body
LE: loop exit
PB: predicated region body
PF: predicated region fallthrough
CT: control target
= control target key end

     0   :  { %10 = vsyncpa [#allocation5], 0  ;;  %s2162_s0 = inlined_call_operand.vmem [shape: bf16[2,32], index: 0, kind: input, shape index: {}]   ;;  %s2163_s1 = inlined_call_operand.vmem [shape: bf16[32,64], index: 1, kind: input, shape index: {}]   ;;  %s2164_s2 = inlined_call_operand.vmem [shape: f32[1,64], index: 2, kind: input, shape index: {}]   ;;  %s2165_s3 = inlined_call_operand.vmem [shape: bf16[64,8192], index: 3, kind: input, shape index: {}]   ;;  %s2166_s4 = inlined_call_operand.vmem [shape: f32[1,8192], index: 4, kind: input, shape index: {}]   ;;  %s2167_s5 = inlined_call_operand.hbm [shape: f32[2,8192], index: 5, kind: output, shape index: {}]  }
   0x1   :  { %12 = vsyncpa [#allocation5 + $0x1], 0  ;;  %s1783_s18 = smov 0   ;;  %s1785_s19 = smov 0  }
   0x2   :  { %s1787_s20 = smov 0   ;;  %s1789_s21 = smov 0  }
   0x3   :  { %s1791_s22 = smov 0   ;;  %s1793_s23 = smov 0  }
   0x4 LB: > { %s1502_s24 = sadd.s32 4294967295, %s1746_s23   ;;  %s1503_s25 = sadd.s32 4294967294, %s1746_s23   ;;  %s1746_s23 = sphi %s1793_s23, %s18_s23   ;;  %s1742_s22 = sphi %s1791_s22, %s2174_s22   ;;  %s1738_s21 = sphi %s1789_s21, %s2173_s21   ;;  %s1734_s20 = sphi %s1787_s20, %s2172_s20   ;;  %s1730_s19 = sphi %s1785_s19, %s2171_s19   ;;  %s1726_s18 = sphi %s1783_s18, %s2170_s18  }
   0x5   : > { %s27_s26 = sadd.s32 1, %s1742_s22  ;;  %s105_s27 = sadd.s32 1, %s1734_s20 }
   0x6   : > { %p28_p0 = scmp.ge.s32.totalorder %s27_s26, 4  ;;  %p112_p1 = scmp.ne.s32.totalorder %s1734_s20, %s1730_s19 }
   0x7   : > { %p113_p2 = scmp.eq.s32.totalorder %s1746_s23, 0  ;;  %p170_p3 = scmp.eq.s32.totalorder %s1502_s24, 3 }
   0x8   : > { %s2176_s26 = smov (%p28_p0, %s27_s26), 0  ;;  %p175_p6 = scmp.ne.s32.totalorder %s1730_s19, %s1726_s18 }
   0x9   : > { %p114_p4 = por %p113_p2, %p112_p1  ;;  %p1822_p5 = por %p170_p3, %p112_p1 }
   0xa   : > { %s102_s29 = ssub.s32 %s1742_s22, %s2176_s26  ;;  %p176_p8 = scmp.eq.s32.totalorder %s1503_s25, 3 }
   0xb   : > { %p103_p7 = scmp.eq.s32.totalorder %s102_s29, 0  ;;  %p1506_p10 = scmp.ge.s32.totalorder %s1746_s23, 4 }
   0xc   : > { %p1833_p9 = por %p176_p8, %p175_p6 }
   0xd   : > { %s1831_s30 = scalar_select %p103_p7, %s1734_s20, %s105_s27  }
   0xe   : > { %204 = sbr.rel (%p1506_p10) target bundleno = 55 (0x37), region = 28 }
  0x13   : > { %207 = sbr.rel (!%p114_p4) target bundleno = 55 (0x37), region = 32  ;;  %s209_s7 = sand.u32 (%p114_p4), 1, %s1734_s20  }
  0x14   : > { %s1596_s8 = sshll.u32 (%p114_p4), %s1742_s22, 6  ;;  %s1507_s9 = sshll.u32 (%p114_p4), %s209_s7, 9 }
  0x15   : > { %s1843_s12 = scalar_lea.vmem (%p114_p4), %s2165_s3, %s1596_s8  ;;  %s1848_s13 = scalar_lea.vmem (%p114_p4), [#allocation3], %s1507_s9 }
  0x16   : > { %v227_v0 = vld [vmem:[%s1843_s12] sm:$0xff] (%p114_p4)  ;;  %v229_v1 = vld [vmem:[%s1843_s12 + $0x8] sm:$0xff] (%p114_p4)  ;;  %v231_v2 = vld [vmem:[%s1843_s12 + $0x10] sm:$0xff] (%p114_p4) }
  0x17   : > { %228 = vst [vmem:[%s1848_s13] sm:$0xff] (%p114_p4), %v227_v0  ;;  %230 = vst [vmem:[%s1848_s13 + $0x8] sm:$0xff] (%p114_p4), %v229_v1  ;;  %v233_v3 = vld [vmem:[%s1843_s12 + $0x18] sm:$0xff] (%p114_p4)  ;;  %v235_v4 = vld [vmem:[%s1843_s12 + $0x20] sm:$0xff] (%p114_p4) }
  0x18   : > { %232 = vst [vmem:[%s1848_s13 + $0x10] sm:$0xff] %v231_v2  ;;  %v237_v5 = vld [vmem:[%s1843_s12 + $0x28] sm:$0xff]  ;;  %234 = vst [vmem:[%s1848_s13 + $0x18] sm:$0xff] %v233_v3  ;;  %v239_v6 = vld [vmem:[%s1843_s12 + $0x30] sm:$0xff] }
  0x19   : > { %236 = vst [vmem:[%s1848_s13 + $0x20] sm:$0xff] %v235_v4  ;;  %238 = vst [vmem:[%s1848_s13 + $0x28] sm:$0xff] %v237_v5  ;;  %v241_v7 = vld [vmem:[%s1843_s12 + $0x38] sm:$0xff]  ;;  %v243_v8 = vld [vmem:[%s1843_s12 + $0x100] sm:$0xff] }
  0x1a   : > { %240 = vst [vmem:[%s1848_s13 + $0x30] sm:$0xff] %v239_v6  ;;  %242 = vst [vmem:[%s1848_s13 + $0x38] sm:$0xff] %v241_v7  ;;  %v245_v9 = vld [vmem:[%s1843_s12 + $0x108] sm:$0xff]  ;;  %v247_v10 = vld [vmem:[%s1843_s12 + $0x110] sm:$0xff] }
  0x1b   : > { %244 = vst [vmem:[%s1848_s13 + $0x40] sm:$0xff] %v243_v8  ;;  %v249_v11 = vld [vmem:[%s1843_s12 + $0x118] sm:$0xff]  ;;  %246 = vst [vmem:[%s1848_s13 + $0x48] sm:$0xff] %v245_v9  ;;  %v251_v12 = vld [vmem:[%s1843_s12 + $0x120] sm:$0xff] }
  0x1c   : > { %248 = vst [vmem:[%s1848_s13 + $0x50] sm:$0xff] %v247_v10  ;;  %250 = vst [vmem:[%s1848_s13 + $0x58] sm:$0xff] %v249_v11  ;;  %v253_v13 = vld [vmem:[%s1843_s12 + $0x128] sm:$0xff]  ;;  %v255_v14 = vld [vmem:[%s1843_s12 + $0x130] sm:$0xff] }
  0x1d   : > { %252 = vst [vmem:[%s1848_s13 + $0x60] sm:$0xff] %v251_v12  ;;  %254 = vst [vmem:[%s1848_s13 + $0x68] sm:$0xff] %v253_v13  ;;  %v257_v15 = vld [vmem:[%s1843_s12 + $0x138] sm:$0xff]  ;;  %v259_v16 = vld [vmem:[%s1843_s12 + $0x200] sm:$0xff] }
  0x1e   : > { %256 = vst [vmem:[%s1848_s13 + $0x70] sm:$0xff] %v255_v14  ;;  %v261_v17 = vld [vmem:[%s1843_s12 + $0x208] sm:$0xff]  ;;  %258 = vst [vmem:[%s1848_s13 + $0x78] sm:$0xff] %v257_v15  ;;  %v263_v18 = vld [vmem:[%s1843_s12 + $0x210] sm:$0xff] }
  0x1f   : > { %260 = vst [vmem:[%s1848_s13 + $0x80] sm:$0xff] %v259_v16  ;;  %262 = vst [vmem:[%s1848_s13 + $0x88] sm:$0xff] %v261_v17  ;;  %v265_v19 = vld [vmem:[%s1843_s12 + $0x218] sm:$0xff]  ;;  %v267_v20 = vld [vmem:[%s1843_s12 + $0x220] sm:$0xff] }
  0x20   : > { %264 = vst [vmem:[%s1848_s13 + $0x90] sm:$0xff] %v263_v18  ;;  %266 = vst [vmem:[%s1848_s13 + $0x98] sm:$0xff] %v265_v19  ;;  %v269_v21 = vld [vmem:[%s1843_s12 + $0x228] sm:$0xff]  ;;  %v271_v22 = vld [vmem:[%s1843_s12 + $0x230] sm:$0xff] }
  0x21   : > { %268 = vst [vmem:[%s1848_s13 + $0xa0] sm:$0xff] %v267_v20  ;;  %v273_v23 = vld [vmem:[%s1843_s12 + $0x238] sm:$0xff]  ;;  %270 = vst [vmem:[%s1848_s13 + $0xa8] sm:$0xff] %v269_v21  ;;  %v275_v24 = vld [vmem:[%s1843_s12 + $0x300] sm:$0xff] }
  0x22   : > { %272 = vst [vmem:[%s1848_s13 + $0xb0] sm:$0xff] %v271_v22  ;;  %274 = vst [vmem:[%s1848_s13 + $0xb8] sm:$0xff] %v273_v23  ;;  %v277_v25 = vld [vmem:[%s1843_s12 + $0x308] sm:$0xff]  ;;  %v279_v26 = vld [vmem:[%s1843_s12 + $0x310] sm:$0xff] }
  0x23   : > { %276 = vst [vmem:[%s1848_s13 + $0xc0] sm:$0xff] %v275_v24  ;;  %278 = vst [vmem:[%s1848_s13 + $0xc8] sm:$0xff] %v277_v25  ;;  %v281_v27 = vld [vmem:[%s1843_s12 + $0x318] sm:$0xff]  ;;  %v283_v28 = vld [vmem:[%s1843_s12 + $0x320] sm:$0xff] }
  0x24   : > { %280 = vst [vmem:[%s1848_s13 + $0xd0] sm:$0xff] %v279_v26  ;;  %v285_v29 = vld [vmem:[%s1843_s12 + $0x328] sm:$0xff]  ;;  %282 = vst [vmem:[%s1848_s13 + $0xd8] sm:$0xff] %v281_v27  ;;  %v287_v30 = vld [vmem:[%s1843_s12 + $0x330] sm:$0xff] }
  0x25   : > { %284 = vst [vmem:[%s1848_s13 + $0xe0] sm:$0xff] %v283_v28  ;;  %286 = vst [vmem:[%s1848_s13 + $0xe8] sm:$0xff] %v285_v29  ;;  %v289_v31 = vld [vmem:[%s1843_s12 + $0x338] sm:$0xff]  ;;  %v291_v32 = vld [vmem:[%s1843_s12 + $0x400] sm:$0xff] }
  0x26   : > { %288 = vst [vmem:[%s1848_s13 + $0xf0] sm:$0xff] %v287_v30  ;;  %290 = vst [vmem:[%s1848_s13 + $0xf8] sm:$0xff] %v289_v31  ;;  %v293_v33 = vld [vmem:[%s1843_s12 + $0x408] sm:$0xff]  ;;  %v295_v34 = vld [vmem:[%s1843_s12 + $0x410] sm:$0xff] }
  0x27   : > { %292 = vst [vmem:[%s1848_s13 + $0x100] sm:$0xff] %v291_v32  ;;  %v297_v35 = vld [vmem:[%s1843_s12 + $0x418] sm:$0xff]  ;;  %294 = vst [vmem:[%s1848_s13 + $0x108] sm:$0xff] %v293_v33  ;;  %v299_v36 = vld [vmem:[%s1843_s12 + $0x420] sm:$0xff] }
  0x28   : > { %296 = vst [vmem:[%s1848_s13 + $0x110] sm:$0xff] %v295_v34  ;;  %298 = vst [vmem:[%s1848_s13 + $0x118] sm:$0xff] %v297_v35  ;;  %v301_v37 = vld [vmem:[%s1843_s12 + $0x428] sm:$0xff]  ;;  %v303_v38 = vld [vmem:[%s1843_s12 + $0x430] sm:$0xff] }
  0x29   : > { %300 = vst [vmem:[%s1848_s13 + $0x120] sm:$0xff] %v299_v36  ;;  %302 = vst [vmem:[%s1848_s13 + $0x128] sm:$0xff] %v301_v37  ;;  %v305_v39 = vld [vmem:[%s1843_s12 + $0x438] sm:$0xff]  ;;  %v307_v40 = vld [vmem:[%s1843_s12 + $0x500] sm:$0xff] }
  0x2a   : > { %304 = vst [vmem:[%s1848_s13 + $0x130] sm:$0xff] %v303_v38  ;;  %v309_v41 = vld [vmem:[%s1843_s12 + $0x508] sm:$0xff]  ;;  %306 = vst [vmem:[%s1848_s13 + $0x138] sm:$0xff] %v305_v39  ;;  %v311_v42 = vld [vmem:[%s1843_s12 + $0x510] sm:$0xff] }
  0x2b   : > { %308 = vst [vmem:[%s1848_s13 + $0x140] sm:$0xff] %v307_v40  ;;  %310 = vst [vmem:[%s1848_s13 + $0x148] sm:$0xff] %v309_v41  ;;  %v313_v43 = vld [vmem:[%s1843_s12 + $0x518] sm:$0xff]  ;;  %v315_v44 = vld [vmem:[%s1843_s12 + $0x520] sm:$0xff] }
  0x2c   : > { %312 = vst [vmem:[%s1848_s13 + $0x150] sm:$0xff] %v311_v42  ;;  %314 = vst [vmem:[%s1848_s13 + $0x158] sm:$0xff] %v313_v43  ;;  %v317_v45 = vld [vmem:[%s1843_s12 + $0x528] sm:$0xff]  ;;  %v319_v46 = vld [vmem:[%s1843_s12 + $0x530] sm:$0xff] }
  0x2d   : > { %316 = vst [vmem:[%s1848_s13 + $0x160] sm:$0xff] %v315_v44  ;;  %v321_v47 = vld [vmem:[%s1843_s12 + $0x538] sm:$0xff]  ;;  %318 = vst [vmem:[%s1848_s13 + $0x168] sm:$0xff] %v317_v45  ;;  %v323_v48 = vld [vmem:[%s1843_s12 + $0x600] sm:$0xff] }
  0x2e   : > { %320 = vst [vmem:[%s1848_s13 + $0x170] sm:$0xff] %v319_v46  ;;  %322 = vst [vmem:[%s1848_s13 + $0x178] sm:$0xff] %v321_v47  ;;  %v325_v49 = vld [vmem:[%s1843_s12 + $0x608] sm:$0xff]  ;;  %v327_v50 = vld [vmem:[%s1843_s12 + $0x610] sm:$0xff] }
  0x2f   : > { %324 = vst [vmem:[%s1848_s13 + $0x180] sm:$0xff] %v323_v48  ;;  %326 = vst [vmem:[%s1848_s13 + $0x188] sm:$0xff] %v325_v49  ;;  %v329_v51 = vld [vmem:[%s1843_s12 + $0x618] sm:$0xff]  ;;  %v331_v52 = vld [vmem:[%s1843_s12 + $0x620] sm:$0xff] }
  0x30   : > { %328 = vst [vmem:[%s1848_s13 + $0x190] sm:$0xff] %v327_v50  ;;  %v333_v53 = vld [vmem:[%s1843_s12 + $0x628] sm:$0xff]  ;;  %330 = vst [vmem:[%s1848_s13 + $0x198] sm:$0xff] %v329_v51  ;;  %v335_v54 = vld [vmem:[%s1843_s12 + $0x630] sm:$0xff] }
  0x31   : > { %332 = vst [vmem:[%s1848_s13 + $0x1a0] sm:$0xff] %v331_v52  ;;  %334 = vst [vmem:[%s1848_s13 + $0x1a8] sm:$0xff] %v333_v53  ;;  %v337_v55 = vld [vmem:[%s1843_s12 + $0x638] sm:$0xff]  ;;  %v339_v56 = vld [vmem:[%s1843_s12 + $0x700] sm:$0xff] }
  0x32   : > { %336 = vst [vmem:[%s1848_s13 + $0x1b0] sm:$0xff] %v335_v54  ;;  %338 = vst [vmem:[%s1848_s13 + $0x1b8] sm:$0xff] %v337_v55  ;;  %v341_v57 = vld [vmem:[%s1843_s12 + $0x708] sm:$0xff]  ;;  %v343_v58 = vld [vmem:[%s1843_s12 + $0x710] sm:$0xff] }
  0x33   : > { %340 = vst [vmem:[%s1848_s13 + $0x1c0] sm:$0xff] %v339_v56  ;;  %v345_v59 = vld [vmem:[%s1843_s12 + $0x718] sm:$0xff]  ;;  %342 = vst [vmem:[%s1848_s13 + $0x1c8] sm:$0xff] %v341_v57  ;;  %v347_v60 = vld [vmem:[%s1843_s12 + $0x720] sm:$0xff] }
  0x34   : > { %344 = vst [vmem:[%s1848_s13 + $0x1d0] sm:$0xff] %v343_v58  ;;  %346 = vst [vmem:[%s1848_s13 + $0x1d8] sm:$0xff] %v345_v59  ;;  %v349_v61 = vld [vmem:[%s1843_s12 + $0x728] sm:$0xff]  ;;  %v351_v62 = vld [vmem:[%s1843_s12 + $0x730] sm:$0xff] }
  0x35   : > { %348 = vst [vmem:[%s1848_s13 + $0x1e0] sm:$0xff] %v347_v60  ;;  %350 = vst [vmem:[%s1848_s13 + $0x1e8] sm:$0xff] %v349_v61  ;;  %v353_v63 = vld [vmem:[%s1843_s12 + $0x738] sm:$0xff] }
  0x36   : > { %352 = vst [vmem:[%s1848_s13 + $0x1f0] sm:$0xff] %v351_v62  ;;  %354 = vst [vmem:[%s1848_s13 + $0x1f8] sm:$0xff] %v353_v63 }
  0x37 PF: > { %p1510_p11 = scmp.ge.s32.totalorder %s1746_s23, 1  ;;  %p367_p12 = scmp.lt.s32.totalorder %s1746_s23, 5 }
  0x39   : > { %p368_p13 = pnand %p1510_p11, %p367_p12 }
  0x3a   : > { %s1978_s14 = sand.u32 (!%p368_p13), 1, %s1730_s19   ;;  %s1513_s15 = sshll.u32 (!%p368_p13), %s1738_s21, 4 }
  0x3b   : > { %371 = sbr.rel (%p368_p13) target bundleno = 562 (0x232), region = 59  ;;  %s1511_s16 = sshll.u32 (!%p368_p13), %s1978_s14, 9 }
  0x3c   : > { %s1512_s17 = sshll.u32 (!%p368_p13), %s1978_s14, 5  ;;  %p413_p0 = scmp.lt.s32.totalorder (!%p368_p13), %s1513_s15, 63 }
  0x3d   : > { %s1988_s29 = scalar_lea.vmem (!%p368_p13), [#allocation3], %s1511_s16  ;;  %s1990_s7 = scalar_lea.vmem (!%p368_p13), [#allocation4], %s1512_s17 }
  0x3e   : > { %p1514_p1 = scmp.ne.s32.totalorder (!%p368_p13), %s1738_s21, 0 }
  0x40   : > { %s2178_s15 = smov (!%p413_p0, %s1513_s15), 63  ;;  %422 = sbr.rel (%p1514_p1) target bundleno = 278 (0x116), region = 67 }
  0x41   : > { %s1986_s27 = scalar_lea.vmem %s2166_s4, %s2178_s15 }
  0x45   : > { %v1668_v0 = vld [vmem:[%s2163_s1 + $0x8] sm:$0xff]   ;;  %v1748_v1 = vmov 0.0   ;;  %v1669_v2 = vld [vmem:[%s2163_s1] sm:$0xff]   ;;  %vm1749_vm0 = vmmov 0   ;;  %vm447_vm1 = vcmask 261120   ;;  %vm493_vm2 = vcmask 516096  }
  0x46   : > { %1601 = vmatprep.subr.bf16.mxu0 %v1748_v1  ;;  %1605 = vmatprep.mubr.msk.bf16.mxu0 %vm1749_vm0, %v1748_v1  ;;  %v423_v3 = vld [vmem:[%s2162_s0] sm:$0x1] }
  0x47   : > { %1602 = vmatpush3.bf16.msra.mxu0 %v1668_v0  ;;  %v1515_v4 = vld [vmem:[%s2164_s2] ss:$0 sm:$0xff] }
  0x48   : > { %1603 = vmatprep.subr.bf16.mxu0 %v1748_v1 }
  0x4b   : > { %1604 = vmatpush3.bf16.msra.mxu0 %v1669_v2 }
  0x4e   : > { %1606 = vmatmul.mubr.msk.bf16.vlgmr.msra.gmra.mxu0 %vm447_vm1, %v423_v3 }
 0x10e   : > { %v485_v5 = vpop.f32.mrf.mxu0 }
 0x10f   : > { %v486_v6 = vadd.f32 %v1515_v4, %v485_v5 }
 0x110   : > { %v1607_v7 = vpop.f32.mrf.mxu0 }
 0x111   : > { %v491_v8 = vmax.f32 %v486_v6, 0.0 }
 0x112   : > { %v488_v9 = vpop.f32.mrf.mxu0 }
 0x113   : > { %v492_v10 = vpack.c.bf16 %v491_v8, %v491_v8 }
 0x114   : > { %v1608_v11 = vpop.f32.mrf.mxu0 }
 0x115   : > { %494 = vst.msk [vmem:[#allocation2] sm:$0x1] %vm493_vm2, %v492_v10 }
 0x116 PF: > { %v544_v12 = vld [vmem:[%s1988_s29 + $0x180] sm:$0xff]  ;;  %v545_v14 = vld [vmem:[%s1988_s29 + $0x188] sm:$0xff]  ;;  %v1750_v20 = vmov 0   ;;  %v546_v43 = vld [vmem:[%s1988_s29 + $0x190] sm:$0xff]  ;;  %vm964_vm3 = vcmask 523264   ;;  %s1597_s17 = sshll.u32 %s1738_s21, 9 }
 0x117   : > { %v552_v13 = vld [vmem:[%s1988_s29 + $0x1c0] sm:$0xff]  ;;  %v553_v16 = vld [vmem:[%s1988_s29 + $0x1c8] sm:$0xff]  ;;  %1000 = vmatprep.mubr.bf16.mxu0 %v1750_v20  ;;  %1041 = vmatprep.mubr.bf16.mxu1 %v1750_v20  ;;  %v554_v44 = vld [vmem:[%s1988_s29 + $0x1d0] sm:$0xff]  ;;  %s1405_s24 = sshll.u32 %s1990_s7, 4  ;;  %s1389_s8 = scalar_lea.sflag [#allocation5], %s1978_s14  ;;  %s1406_s24 = int_to_ptr.vmem [resolvable:$true] %s1405_s24 }
 0x118   : > { %v1568_v15 = vcombine.high %v544_v12, %v552_v13  ;;  %v1567_v17 = vcombine.low %v544_v12, %v552_v13  ;;  %v528_v18 = vld [vmem:[%s1988_s29 + $0x100] sm:$0xff]  ;;  %v1570_v21 = vcombine.high %v545_v14, %v553_v16  ;;  %v1569_v22 = vcombine.low %v545_v14, %v553_v16  ;;  %v529_v24 = vld [vmem:[%s1988_s29 + $0x108] sm:$0xff]  ;;  %v547_v45 = vld [vmem:[%s1988_s29 + $0x198] sm:$0xff]  ;;  %s1670_s9 = scalar_lea.vmem %s1406_s24, 512  ;;  %s1752_s10 = smov [#allocation4]  }
 0x119   : > { %v536_v19 = vld [vmem:[%s1988_s29 + $0x140] sm:$0xff]  ;;  %v537_v25 = vld [vmem:[%s1988_s29 + $0x148] sm:$0xff]  ;;  %v555_v46 = vld [vmem:[%s1988_s29 + $0x1d8] sm:$0xff]  ;;  %v1572_v49 = vcombine.high %v546_v43, %v554_v44  ;;  %v1571_v56 = vcombine.low %v546_v43, %v554_v44  ;;  %p1671_p2 = scmp.ne.s32.totalorder %s1406_s24, %s1670_s9  ;;  %s1674_s11 = sshll.u32 %s1752_s10, 4  ;;  %s1675_s11 = int_to_ptr.vmem [resolvable:$false] %s1674_s11 }
 0x11a   : > { %v1552_v23 = vcombine.high %v528_v18, %v536_v19  ;;  %v512_v26 = vld [vmem:[%s1988_s29 + $0x80] sm:$0xff]  ;;  %976 = vmatprep.subr.bf16.mxu0 %v1568_v15  ;;  %v1554_v27 = vcombine.high %v529_v24, %v537_v25  ;;  %v513_v29 = vld [vmem:[%s1988_s29 + $0x88] sm:$0xff]  ;;  %1017 = vmatprep.subr.bf16.mxu1 %v1570_v21  ;;  %v1551_v31 = vcombine.low %v528_v18, %v536_v19  ;;  %v530_v51 = vld [vmem:[%s1988_s29 + $0x110] sm:$0xff]  ;;  %s1676_s21 = scalar_lea.vmem %s1675_s11, 1024  ;;  %p1677_p6 = scmp.lt.s32.totalorder %s1406_s24, %s1675_s11 }
 0x11b   : > { %v520_v28 = vld [vmem:[%s1988_s29 + $0xc0] sm:$0xff]  ;;  %v521_v30 = vld [vmem:[%s1988_s29 + $0xc8] sm:$0xff]  ;;  %977 = vmatpush1.bf16.msra.mxu0 %v1567_v17  ;;  %1018 = vmatpush1.bf16.msra.mxu1 %v1569_v22  ;;  %v1553_v32 = vcombine.low %v529_v24, %v537_v25  ;;  %v1574_v50 = vcombine.high %v547_v45, %v555_v46  ;;  %v538_v52 = vld [vmem:[%s1988_s29 + $0x150] sm:$0xff]  ;;  %v1573_v57 = vcombine.low %v547_v45, %v555_v46  ;;  %p1672_p3 = pnand %p1671_p2, %p1822_p5  ;;  %p1678_p7 = scmp.lt.s32.totalorder %s1676_s21, %s1670_s9 }
 0x11c   : > { %978 = vmatprep.subr.bf16.mxu0 %v1552_v23  ;;  %v1536_v33 = vcombine.high %v512_v26, %v520_v28  ;;  %1019 = vmatprep.subr.bf16.mxu1 %v1554_v27  ;;  %v1538_v34 = vcombine.high %v513_v29, %v521_v30  ;;  %v496_v35 = vld [vmem:[%s1988_s29] sm:$0xff]  ;;  %v497_v37 = vld [vmem:[%s1988_s29 + $0x8] sm:$0xff]  ;;  %v1535_v39 = vcombine.low %v512_v26, %v520_v28  ;;  %v531_v53 = vld [vmem:[%s1988_s29 + $0x118] sm:$0xff] }
 0x11d   : > { %v504_v36 = vld [vmem:[%s1988_s29 + $0x40] sm:$0xff]  ;;  %v505_v38 = vld [vmem:[%s1988_s29 + $0x48] sm:$0xff]  ;;  %v1537_v40 = vcombine.low %v513_v29, %v521_v30  ;;  %v539_v54 = vld [vmem:[%s1988_s29 + $0x158] sm:$0xff]  ;;  %v1556_v58 = vcombine.high %v530_v51, %v538_v52  ;;  %v1555_v0 = vcombine.low %v530_v51, %v538_v52  ;;  %p1673_p4 = pneg %p1672_p3  ;;  %p1679_p8 = por %p1678_p7, %p1677_p6 }
 0x11e   : > { %v1520_v41 = vcombine.high %v496_v35, %v504_v36  ;;  %v1522_v42 = vcombine.high %v497_v37, %v505_v38  ;;  %v1519_v47 = vcombine.low %v496_v35, %v504_v36  ;;  %v1521_v48 = vcombine.low %v497_v37, %v505_v38  ;;  %v2031_v55 = vld [vmem:[#allocation2] sm:$0x1]  ;;  %v514_v60 = vld [vmem:[%s1988_s29 + $0x90] sm:$0xff]  ;;  %v548_v12 = vld [vmem:[%s1988_s29 + $0x1a0] sm:$0xff] }
 0x11f   : > { %979 = vmatpush1.bf16.msra.mxu0 %v1551_v31  ;;  %1020 = vmatpush1.bf16.msra.mxu1 %v1553_v32  ;;  %v1558_v59 = vcombine.high %v531_v53, %v539_v54  ;;  %v522_v61 = vld [vmem:[%s1988_s29 + $0xd0] sm:$0xff]  ;;  %v515_v62 = vld [vmem:[%s1988_s29 + $0x98] sm:$0xff]  ;;  %v1557_v1 = vcombine.low %v531_v53, %v539_v54  ;;  %v556_v13 = vld [vmem:[%s1988_s29 + $0x1e0] sm:$0xff]  ;;  %p1680_p10 = pnand %p1679_p8, %p1673_p4 }
 0x120   : > { %980 = vmatprep.subr.bf16.mxu0 %v1536_v33  ;;  %1021 = vmatprep.subr.bf16.mxu1 %v1538_v34  ;;  %v523_v63 = vld [vmem:[%s1988_s29 + $0xd8] sm:$0xff]  ;;  %v1540_v2 = vcombine.high %v514_v60, %v522_v61  ;;  %v498_v4 = vld [vmem:[%s1988_s29 + $0x10] sm:$0xff]  ;;  %v1539_v8 = vcombine.low %v514_v60, %v522_v61  ;;  %v549_v14 = vld [vmem:[%s1988_s29 + $0x1a8] sm:$0xff]  ;;  %v1576_v18 = vcombine.high %v548_v12, %v556_v13 }
 0x121   : > { %v1542_v3 = vcombine.high %v515_v62, %v523_v63  ;;  %v506_v5 = vld [vmem:[%s1988_s29 + $0x50] sm:$0xff]  ;;  %v499_v6 = vld [vmem:[%s1988_s29 + $0x18] sm:$0xff]  ;;  %v1541_v9 = vcombine.low %v515_v62, %v523_v63  ;;  %v557_v15 = vld [vmem:[%s1988_s29 + $0x1e8] sm:$0xff]  ;;  %v1575_v25 = vcombine.low %v548_v12, %v556_v13 }
 0x122   : > { %v507_v7 = vld [vmem:[%s1988_s29 + $0x58] sm:$0xff]  ;;  %v1524_v10 = vcombine.high %v498_v4, %v506_v5  ;;  %v1523_v16 = vcombine.low %v498_v4, %v506_v5  ;;  %v1578_v19 = vcombine.high %v549_v14, %v557_v15  ;;  %v532_v21 = vld [vmem:[%s1988_s29 + $0x120] sm:$0xff]  ;;  %v533_v23 = vld [vmem:[%s1988_s29 + $0x128] sm:$0xff]  ;;  %v1577_v26 = vcombine.low %v549_v14, %v557_v15 }
 0x123   : > { %981 = vmatpush1.bf16.msra.mxu0 %v1535_v39  ;;  %1022 = vmatpush1.bf16.msra.mxu1 %v1537_v40  ;;  %v1526_v11 = vcombine.high %v499_v6, %v507_v7  ;;  %v1525_v17 = vcombine.low %v499_v6, %v507_v7  ;;  %v540_v22 = vld [vmem:[%s1988_s29 + $0x160] sm:$0xff]  ;;  %v541_v24 = vld [vmem:[%s1988_s29 + $0x168] sm:$0xff]  ;;  %v550_v45 = vld [vmem:[%s1988_s29 + $0x1b0] sm:$0xff] }
 0x124   : > { %982 = vmatprep.subr.bf16.mxu0 %v1520_v41  ;;  %1023 = vmatprep.subr.bf16.mxu1 %v1522_v42  ;;  %v1560_v27 = vcombine.high %v532_v21, %v540_v22  ;;  %v1562_v28 = vcombine.high %v533_v23, %v541_v24  ;;  %v516_v29 = vld [vmem:[%s1988_s29 + $0xa0] sm:$0xff]  ;;  %v517_v31 = vld [vmem:[%s1988_s29 + $0xa8] sm:$0xff]  ;;  %v1559_v33 = vcombine.low %v532_v21, %v540_v22  ;;  %v558_v46 = vld [vmem:[%s1988_s29 + $0x1f0] sm:$0xff]  ;;  %v1751_v22 = vmov 1983009808  }
 0x125   : > { %v524_v30 = vld [vmem:[%s1988_s29 + $0xe0] sm:$0xff]  ;;  %v525_v32 = vld [vmem:[%s1988_s29 + $0xe8] sm:$0xff]  ;;  %v1561_v34 = vcombine.low %v533_v23, %v541_v24  ;;  %v1580_v51 = vcombine.high %v550_v45, %v558_v46  ;;  %v534_v53 = vld [vmem:[%s1988_s29 + $0x130] sm:$0xff]  ;;  %v1315_v23 = vunpack.c.l.s4 %v1751_v22 }
 0x126   : > { %v1544_v35 = vcombine.high %v516_v29, %v524_v30  ;;  %v1546_v36 = vcombine.high %v517_v31, %v525_v32  ;;  %v500_v37 = vld [vmem:[%s1988_s29 + $0x20] sm:$0xff]  ;;  %v501_v39 = vld [vmem:[%s1988_s29 + $0x28] sm:$0xff]  ;;  %v1543_v41 = vcombine.low %v516_v29, %v524_v30  ;;  %v1545_v42 = vcombine.low %v517_v31, %v525_v32  ;;  %v542_v54 = vld [vmem:[%s1988_s29 + $0x170] sm:$0xff] }
 0x127   : > { %983 = vmatpush1.bf16.msra.mxu0 %v1519_v47  ;;  %1024 = vmatpush1.bf16.msra.mxu1 %v1521_v48  ;;  %v508_v38 = vld [vmem:[%s1988_s29 + $0x60] sm:$0xff]  ;;  %v509_v40 = vld [vmem:[%s1988_s29 + $0x68] sm:$0xff]  ;;  %v551_v47 = vld [vmem:[%s1988_s29 + $0x1b8] sm:$0xff]  ;;  %v1564_v60 = vcombine.high %v534_v53, %v542_v54 }
 0x128   : > { %1058 = vmatprep.subr.bf16.mxu0 %v1572_v49  ;;  %1099 = vmatprep.subr.bf16.mxu1 %v1574_v50  ;;  %v1528_v43 = vcombine.high %v500_v37, %v508_v38  ;;  %v1530_v44 = vcombine.high %v501_v39, %v509_v40  ;;  %v559_v48 = vld [vmem:[%s1988_s29 + $0x1f8] sm:$0xff]  ;;  %v1527_v49 = vcombine.low %v500_v37, %v508_v38  ;;  %v518_v62 = vld [vmem:[%s1988_s29 + $0xb0] sm:$0xff] }
 0x129   : > { %v1529_v50 = vcombine.low %v501_v39, %v509_v40  ;;  %v1582_v52 = vcombine.high %v551_v47, %v559_v48  ;;  %v526_v63 = vld [vmem:[%s1988_s29 + $0xf0] sm:$0xff] }
 0x12a   : > { %1583 = vmatmul.mubr.msk.bf16.vlgmr.msra.gmra.mxu0 %vm964_vm3, %v2031_v55  ;;  %1584 = vmatmul.mubr.msk.bf16.vlgmr.msra.gmra.mxu1 %vm964_vm3, %v2031_v55  ;;  %v1548_v4 = vcombine.high %v518_v62, %v526_v63  ;;  %v502_v6 = vld [vmem:[%s1988_s29 + $0x30] sm:$0xff] }
 0x12b   : > { %1059 = vmatpush1.bf16.msra.mxu0 %v1571_v56  ;;  %1100 = vmatpush1.bf16.msra.mxu1 %v1573_v57  ;;  %v535_v56 = vld [vmem:[%s1988_s29 + $0x138] sm:$0xff]  ;;  %v510_v7 = vld [vmem:[%s1988_s29 + $0x70] sm:$0xff] }
 0x12c   : > { %1060 = vmatprep.subr.bf16.mxu0 %v1556_v58  ;;  %1101 = vmatprep.subr.bf16.mxu1 %v1558_v59  ;;  %v543_v57 = vld [vmem:[%s1988_s29 + $0x178] sm:$0xff]  ;;  %v1579_v58 = vcombine.low %v550_v45, %v558_v46  ;;  %v1581_v59 = vcombine.low %v551_v47, %v559_v48  ;;  %v1532_v12 = vcombine.high %v502_v6, %v510_v7 }
 0x12d   : > { %1082 = vmatprep.mubr.bf16.mxu0 %v1750_v20  ;;  %1123 = vmatprep.mubr.bf16.mxu1 %v1750_v20  ;;  %v1566_v61 = vcombine.high %v535_v56, %v543_v57  ;;  %v1531_v14 = vcombine.low %v502_v6, %v510_v7 }
 0x12f   : > { %1061 = vmatpush1.bf16.msra.mxu0 %v1555_v0  ;;  %1102 = vmatpush1.bf16.msra.mxu1 %v1557_v1  ;;  %v519_v0 = vld [vmem:[%s1988_s29 + $0xb8] sm:$0xff] }
 0x130   : > { %1062 = vmatprep.subr.bf16.mxu0 %v1540_v2  ;;  %1103 = vmatprep.subr.bf16.mxu1 %v1542_v3  ;;  %v527_v1 = vld [vmem:[%s1988_s29 + $0xf8] sm:$0xff]  ;;  %v1563_v2 = vcombine.low %v534_v53, %v542_v54  ;;  %v1565_v3 = vcombine.low %v535_v56, %v543_v57 }
 0x131   : > { %v1550_v5 = vcombine.high %v519_v0, %v527_v1 }
 0x133   : > { %1063 = vmatpush1.bf16.msra.mxu0 %v1539_v8  ;;  %1104 = vmatpush1.bf16.msra.mxu1 %v1541_v9  ;;  %v503_v8 = vld [vmem:[%s1988_s29 + $0x38] sm:$0xff] }
 0x134   : > { %1064 = vmatprep.subr.bf16.mxu0 %v1524_v10  ;;  %1105 = vmatprep.subr.bf16.mxu1 %v1526_v11  ;;  %v511_v9 = vld [vmem:[%s1988_s29 + $0x78] sm:$0xff]  ;;  %v1547_v10 = vcombine.low %v518_v62, %v526_v63  ;;  %v1549_v11 = vcombine.low %v519_v0, %v527_v1  ;;  %s1403_s29 = scalar_lea.hbm %s2167_s5, %s1597_s17 }
 0x135   : > { %v1534_v13 = vcombine.high %v503_v8, %v511_v9  ;;  %v1533_v15 = vcombine.low %v503_v8, %v511_v9  ;;  %v561_v9 = vld [vmem:[%s1986_s27 + $0x8] sm:$0xff] }
 0x137   : > { %1065 = vmatpush1.bf16.msra.mxu0 %v1523_v16  ;;  %1106 = vmatpush1.bf16.msra.mxu1 %v1525_v17 }
 0x138   : > { %1140 = vmatprep.subr.bf16.mxu0 %v1576_v18  ;;  %1181 = vmatprep.subr.bf16.mxu1 %v1578_v19  ;;  %v560_v18 = vld [vmem:[%s1986_s27] sm:$0xff] }
 0x13a   : > { %1585 = vmatmul.mubr.msk.bf16.vlgmr.msra.gmra.mxu0 %vm964_vm3, %v2031_v55  ;;  %1586 = vmatmul.mubr.msk.bf16.vlgmr.msra.gmra.mxu1 %vm964_vm3, %v2031_v55 }
 0x13b   : > { %1141 = vmatpush1.bf16.msra.mxu0 %v1575_v25  ;;  %1182 = vmatpush1.bf16.msra.mxu1 %v1577_v26 }
 0x13c   : > { %1142 = vmatprep.subr.bf16.mxu0 %v1560_v27  ;;  %1183 = vmatprep.subr.bf16.mxu1 %v1562_v28  ;;  %v1316_v28 = vunpack.c.0.s8 %v1315_v23 }
 0x13d   : > { %1164 = vmatprep.mubr.bf16.mxu0 %v1750_v20  ;;  %1205 = vmatprep.mubr.bf16.mxu1 %v1750_v20 }
 0x13f   : > { %1143 = vmatpush1.bf16.msra.mxu0 %v1559_v33  ;;  %1184 = vmatpush1.bf16.msra.mxu1 %v1561_v34 }
 0x140   : > { %1144 = vmatprep.subr.bf16.mxu0 %v1544_v35  ;;  %1185 = vmatprep.subr.bf16.mxu1 %v1546_v36 }
 0x143   : > { %1145 = vmatpush1.bf16.msra.mxu0 %v1543_v41  ;;  %1186 = vmatpush1.bf16.msra.mxu1 %v1545_v42 }
 0x144   : > { %1146 = vmatprep.subr.bf16.mxu0 %v1528_v43  ;;  %1187 = vmatprep.subr.bf16.mxu1 %v1530_v44 }
 0x147   : > { %1147 = vmatpush1.bf16.msra.mxu0 %v1527_v49  ;;  %1188 = vmatpush1.bf16.msra.mxu1 %v1529_v50 }
 0x148   : > { %1222 = vmatprep.subr.bf16.mxu0 %v1580_v51  ;;  %1263 = vmatprep.subr.bf16.mxu1 %v1582_v52 }
 0x14a   : > { %1587 = vmatmul.mubr.msk.bf16.vlgmr.msra.gmra.mxu0 %vm964_vm3, %v2031_v55  ;;  %1588 = vmatmul.mubr.msk.bf16.vlgmr.msra.gmra.mxu1 %vm964_vm3, %v2031_v55 }
 0x14b   : > { %1223 = vmatpush1.bf16.msra.mxu0 %v1579_v58  ;;  %1264 = vmatpush1.bf16.msra.mxu1 %v1581_v59 }
 0x14c   : > { %1224 = vmatprep.subr.bf16.mxu0 %v1564_v60  ;;  %1265 = vmatprep.subr.bf16.mxu1 %v1566_v61 }
 0x14d   : > { %1246 = vmatprep.mubr.bf16.mxu0 %v1750_v20  ;;  %1287 = vmatprep.mubr.bf16.mxu1 %v1750_v20  ;;  %v564_v20 = vlaneseq }
 0x14f   : > { %1225 = vmatpush1.bf16.msra.mxu0 %v1563_v2  ;;  %1266 = vmatpush1.bf16.msra.mxu1 %v1565_v3  ;;  %v2095_v16 = vshrl.u32 %v564_v20, 7 }
 0x150   : > { %1226 = vmatprep.subr.bf16.mxu0 %v1548_v4  ;;  %1267 = vmatprep.subr.bf16.mxu1 %v1550_v5 }
 0x151   : > { %v566_v17 = vsub.s32 0, %v2095_v16  ;;  %v574_v19 = vsub.s32 2, %v2095_v16  ;;  %v570_v21 = vsub.s32 1, %v2095_v16  ;;  %v578_v24 = vsub.s32 3, %v2095_v16 }
 0x152   : > { %v2103_v35 = vsub.s32 %v1316_v28, %v2095_v16  ;;  %v582_v46 = vsub.s32 4, %v2095_v16  ;;  %v590_v48 = vsub.s32 6, %v2095_v16  ;;  %v586_v49 = vsub.s32 5, %v2095_v16 }
 0x153   : > { %1227 = vmatpush1.bf16.msra.mxu0 %v1547_v10  ;;  %1268 = vmatpush1.bf16.msra.mxu1 %v1549_v11  ;;  %v567_v25 = vrot.slane %v560_v18, %v566_v17  ;;  %v575_v26 = vrot.slane %v560_v18, %v574_v19  ;;  %v571_v27 = vrot.slane %v560_v18, %v570_v21  ;;  %v594_v50 = vsub.s32 7, %v2095_v16 }
 0x154   : > { %1228 = vmatprep.subr.bf16.mxu0 %v1532_v12  ;;  %1269 = vmatprep.subr.bf16.mxu1 %v1534_v13  ;;  %v583_v51 = vrot.slane %v560_v18, %v582_v46  ;;  %v591_v52 = vrot.slane %v560_v18, %v590_v48  ;;  %v587_v53 = vrot.slane %v560_v18, %v586_v49 }
 0x155   : > { %v595_v56 = vrot.slane %v560_v18, %v594_v50  ;;  %v599_v10 = vrot.slane %v561_v9, %v566_v17  ;;  %v607_v11 = vrot.slane %v561_v9, %v574_v19  ;;  %v603_v12 = vrot.slane %v561_v9, %v570_v21 }
 0x157   : > { %1229 = vmatpush1.bf16.msra.mxu0 %v1531_v14  ;;  %1270 = vmatpush1.bf16.msra.mxu1 %v1533_v15  ;;  %v611_v14 = vrot.slane %v561_v9, %v578_v24 }
 0x15a   : > { %1589 = vmatmul.mubr.msk.bf16.vlgmr.msra.gmra.mxu0 %vm964_vm3, %v2031_v55  ;;  %1590 = vmatmul.mubr.msk.bf16.vlgmr.msra.gmra.mxu1 %vm964_vm3, %v2031_v55  ;;  %v579_v55 = vrot.slane %v560_v18, %v578_v24  ;;  %v615_v24 = vrot.slane %v561_v9, %v582_v46 }
 0x1ea   : > { %v1002_v29 = vpop.f32.mrf.mxu0  ;;  %v1043_v31 = vpop.f32.mrf.mxu1 }
 0x1eb   : > { %v1003_v30 = vadd.f32 %v1002_v29, %v567_v25  ;;  %v1044_v32 = vadd.f32 %v1043_v31, %v575_v26  ;;  %v619_v31 = vrot.slane %v561_v9, %v586_v49 }
 0x1ec   : > { %v1004_v33 = vpop.f32.mrf.mxu0  ;;  %v1045_v36 = vpop.f32.mrf.mxu1 }
 0x1ed   : > { %v1005_v34 = vadd.f32 %v1004_v33, %v571_v27  ;;  %v1046_v37 = vadd.f32 %v1045_v36, %v579_v55  ;;  %v623_v33 = vrot.slane %v561_v9, %v590_v48 }
 0x1ee   : > { %v1006_v38 = vpop.f32.mrf.mxu0  ;;  %v1047_v40 = vpop.f32.mrf.mxu1 }
 0x1ef   : > { %v1312_v39 = vcombine.low %v1003_v30, %v1005_v34  ;;  %v1313_v41 = vcombine.low %v1044_v32, %v1046_v37  ;;  %v627_v34 = vrot.slane %v561_v9, %v594_v50 }
 0x1f0   : > { %v1007_v42 = vpop.f32.mrf.mxu0  ;;  %v1048_v44 = vpop.f32.mrf.mxu1 }
 0x1f1   : > { %v1320_v43 = vrot.slane %v1312_v39, %v2103_v35  ;;  %v1327_v45 = vrot.slane %v1313_v41, %v2103_v35 }
 0x1f3   : > { %v1328_v47 = vcombine.low %v1320_v43, %v1327_v45 }
 0x1f5   : > { %1384 = vst [vmem:[%s1990_s7] sm:$0xff] %v1328_v47 }
 0x1fa   : > { %v1084_v54 = vpop.f32.mrf.mxu0  ;;  %v1125_v58 = vpop.f32.mrf.mxu1 }
 0x1fb   : > { %v1085_v57 = vadd.f32 %v1084_v54, %v583_v51  ;;  %v1126_v59 = vadd.f32 %v1125_v58, %v591_v52 }
 0x1fc   : > { %v1086_v60 = vpop.f32.mrf.mxu0  ;;  %v1127_v62 = vpop.f32.mrf.mxu1 }
 0x1fd   : > { %v1087_v61 = vadd.f32 %v1086_v60, %v587_v53  ;;  %v1128_v63 = vadd.f32 %v1127_v62, %v595_v56 }
 0x1fe   : > { %v1088_v0 = vpop.f32.mrf.mxu0  ;;  %v1129_v2 = vpop.f32.mrf.mxu1 }
 0x1ff   : > { %v1329_v1 = vcombine.low %v1085_v57, %v1087_v61  ;;  %v1330_v3 = vcombine.low %v1126_v59, %v1128_v63 }
 0x200   : > { %v1089_v4 = vpop.f32.mrf.mxu0  ;;  %v1130_v6 = vpop.f32.mrf.mxu1 }
 0x201   : > { %v1337_v5 = vrot.slane %v1329_v1, %v2103_v35  ;;  %v1344_v7 = vrot.slane %v1330_v3, %v2103_v35 }
 0x203   : > { %v1345_v8 = vcombine.low %v1337_v5, %v1344_v7 }
 0x205   : > { %1385 = vst [vmem:[%s1990_s7 + $0x8] sm:$0xff] %v1345_v8 }
 0x20a   : > { %v1166_v13 = vpop.f32.mrf.mxu0  ;;  %v1207_v20 = vpop.f32.mrf.mxu1 }
 0x20b   : > { %v1167_v15 = vadd.f32 %v1166_v13, %v599_v10  ;;  %v1208_v16 = vadd.f32 %v1207_v20, %v607_v11 }
 0x20c   : > { %v1168_v18 = vpop.f32.mrf.mxu0  ;;  %v1209_v23 = vpop.f32.mrf.mxu1 }
 0x20d   : > { %v1169_v22 = vadd.f32 %v1168_v18, %v603_v12  ;;  %v1210_v25 = vadd.f32 %v1209_v23, %v611_v14 }
 0x20e   : > { %v1170_v26 = vpop.f32.mrf.mxu0  ;;  %v1211_v28 = vpop.f32.mrf.mxu1 }
 0x20f   : > { %v1346_v27 = vcombine.low %v1167_v15, %v1169_v22  ;;  %v1347_v29 = vcombine.low %v1208_v16, %v1210_v25 }
 0x210   : > { %v1171_v55 = vpop.f32.mrf.mxu0  ;;  %v1212_v17 = vpop.f32.mrf.mxu1 }
 0x211   : > { %v1354_v30 = vrot.slane %v1346_v27, %v2103_v35  ;;  %v1361_v19 = vrot.slane %v1347_v29, %v2103_v35 }
 0x213   : > { %v1362_v21 = vcombine.low %v1354_v30, %v1361_v19 }
 0x215   : > { %1386 = vst [vmem:[%s1990_s7 + $0x10] sm:$0xff] %v1362_v21 }
 0x21a   : > { %v1248_v32 = vpop.f32.mrf.mxu0  ;;  %v1289_v36 = vpop.f32.mrf.mxu1 }
 0x21b   : > { %v1249_v38 = vadd.f32 %v1248_v32, %v615_v24  ;;  %v1290_v41 = vadd.f32 %v1289_v36, %v623_v33 }
 0x21c   : > { %v1250_v37 = vpop.f32.mrf.mxu0  ;;  %v1291_v40 = vpop.f32.mrf.mxu1 }
 0x21d   : > { %v1251_v39 = vadd.f32 %v1250_v37, %v619_v31  ;;  %v1292_v42 = vadd.f32 %v1291_v40, %v627_v34 }
 0x21e   : > { %v1252_v43 = vpop.f32.mrf.mxu0  ;;  %v1293_v45 = vpop.f32.mrf.mxu1 }
 0x21f   : > { %v1363_v44 = vcombine.low %v1249_v38, %v1251_v39  ;;  %v1364_v46 = vcombine.low %v1290_v41, %v1292_v42 }
 0x220   : > { %v1253_v47 = vpop.f32.mrf.mxu0  ;;  %v1294_v49 = vpop.f32.mrf.mxu1 }
 0x221   : > { %v1371_v48 = vrot.slane %v1363_v44, %v2103_v35  ;;  %v1378_v50 = vrot.slane %v1364_v46, %v2103_v35 }
 0x223   : > { %v1379_v51 = vcombine.low %v1371_v48, %v1378_v50 }
 0x225   : > { %1387 = vst [vmem:[%s1990_s7 + $0x18] sm:$0xff] %v1379_v51 }
 0x226   : > { %1683 = shalt.err (!%p1680_p10)
}
 0x227   : > { %s1684_s12 = scalar_lea.hbm %s1403_s29, 512  ;;  %s1688_s13 = scalar_lea.hbm %s2167_s5, 2048 }
 0x228   : > { %p1685_p11 = scmp.ne.s32.totalorder %s1403_s29, %s1684_s12  ;;  %p1689_p0 = scmp.lt.s32.totalorder %s1403_s29, %s2167_s5 }
 0x229   : > { %p1690_p1 = scmp.lt.s32.totalorder %s1688_s13, %s1684_s12 }
 0x22a   : > { %p1686_p12 = pnand %p1685_p11, %p1822_p5 }
 0x22b   : > { %p1691_p2 = por %p1690_p1, %p1689_p0 }
 0x22c   : > { %p1687_p13 = pneg %p1686_p12 }
 0x22e   : > { %p1692_p3 = pnand %p1691_p2, %p1687_p13 }
 0x230   : > { %1695 = shalt.err (!%p1692_p3)
}
 0x231   : > { %1609 = dma.vmem_to_hbm [thread:$0]  (%p1822_p5), %s1406_s24, 512, %s1403_s29, %s1389_s8  }
 0x232 PF: > { %p1615_p4 = scmp.ge.s32.totalorder %s1746_s23, 2  ;;  %s1417_s17 = sand.u32 1, %s1726_s18  }
 0x233   : > { %s1418_s25 = scalar_lea.sflag [#allocation5], %s1417_s17 }
 0x234   : > { %p1612_p6 = pnand %p1615_p4, %p1833_p9 }
 0x236   : > { %p1613_p7 = pneg %p1612_p6 }
 0x238   : > { %1721 = dma.done.wait (%p1613_p7), %s1418_s25, 512  }
 0x239   : > { %1723 = vsyncadd (%p1613_p7), %s1418_s25, 4294966784  ;;  %s18_s23 = sadd.s32 1, %s1746_s23   ;;  %s2170_s18 = smov %s1730_s19 }
 0x23a   : > { %p15_p8 = scmp.ge.s32.totalorder %s18_s23, 6   ;;  %s2171_s19 = smov %s1734_s20 }
 0x23b   : > { %s2172_s20 = smov %s1831_s30  ;;  %s2173_s21 = smov %s1742_s22 }
 0x23c   : > { %s2174_s22 = smov %s2176_s26  ;;  %17 = sbr.rel (!%p15_p8) target bundleno = 4 (0x4), region = 113 }
 0x241   :  { %1423 = vsyncpa [#allocation5], 1 }
 0x242   :  { %1425 = vsyncpa [#allocation5 + $0x1], 1 }

</bundles_post_ra>
